<compile_context>
chip_gen: v7x
topology: tpu7x:2x2x1
jax: 0.10.0
libtpu: 0.0.40
codegen_flags: <defaults>
</compile_context>

<pallas_src>
import jax
import jax.numpy as jnp
from jax.experimental import pallas as pl
from jax.experimental.pallas import tpu as pltpu


def _round_up(x: int, m: int) -> int:
    return (x + m - 1) // m * m


def copy_predictor_kernel(x_ref, w1_ref, b1_ref, w2_ref, p_ref):
    """One row-tile of the CopyPredictor hot path.

    x_ref : (TILE, D)  row tile of the flattened encoder outputs
    w1_ref: (D, H)     first Linear weight (resident across the grid)
    b1_ref: (1, H)     first Linear bias
    w2_ref: (1, H)     second Linear weight as a row vector (no bias)
    p_ref : (1, TILE)  sigmoid probabilities, lane-dense output slab
    """
    # hidden = relu(x @ W1 + b1)  -- MXU matmul with f32 accumulation.
    h = jnp.dot(x_ref[...], w1_ref[...], preferred_element_type=jnp.float32)
    h = jnp.maximum(h + b1_ref[...], 0.0)

    # logit[r] = <w2, h[r]> for every row, computed as an NT matmul
    # (1, H) x (TILE, H)^T -> (1, TILE): full MXU column utilization and the
    # result is already lane-dense -- no (TILE, 1) lane-sparse store and no
    # in-kernel transpose needed.
    logit = jax.lax.dot_general(
        w2_ref[...], h,
        dimension_numbers=(((1,), (1,)), ((), ())),
        preferred_element_type=jnp.float32,
    )  # (1, TILE)

    p_ref[...] = jax.nn.sigmoid(logit)  # EUP


def copy_predictor_forward(encoder_outputs, mask, w1, b1, w2, beta):
    """Mirror of CopyPredictor.forward (use_attention is hard-coded False).

    encoder_outputs: (B, S, D) float32
    mask           : (B, S) int or None
    w1: (D, H), b1: (H,), w2: (H,)   -- nn.Linear params
    beta           : python float

    Returns (scores (S, B) f32, None, {'attention_score': None,
                                       'sequence': (S, B) i32})
    """
    B, S, D = encoder_outputs.shape
    H = w1.shape[1]

    if mask is not None and beta == 1:
        # Early-return branch of the PyTorch forward.
        return mask.T.astype(jnp.float32), None, None

    N = B * S
    x = encoder_outputs.reshape(N, D)

    # Row tile: multiple of 128 so the (1, TILE) output slab is lane-dense;
    # capped at 512 rows (fits comfortably in scoped VMEM on v5e/v6e/v7x with
    # double buffering, yet large enough to amortize per-grid-step overhead).
    TILE = 512 if N >= 512 else _round_up(max(N, 1), 128)
    n_pad = _round_up(N, TILE)
    if n_pad != N:
        x = jnp.pad(x, ((0, n_pad - N), (0, 0)))
    num_tiles = n_pad // TILE

    b1_row = b1.reshape(1, H)
    w2_row = w2.reshape(1, H)

    # Tile-driven VMEM budget (double-buffered x tile + output slab + resident
    # weights), with headroom; capped below v7x's 64 MiB physical VMEM.
    tile_vmem = 4 * (2 * TILE * D + 2 * TILE + 2 * (D * H + 2 * H))
    vmem_limit = int(min(max(4 * tile_vmem, 16 * 1024 * 1024), 48 * 1024 * 1024))

    cost = pl.CostEstimate(
        flops=2 * n_pad * D * H + 2 * n_pad * H,
        transcendentals=n_pad,
        bytes_accessed=4 * (n_pad * D + n_pad + D * H + 2 * H),
    )

    p_slab = pl.pallas_call(
        copy_predictor_kernel,
        out_shape=jax.ShapeDtypeStruct((1, n_pad), jnp.float32),
        grid=(num_tiles,),
        in_specs=[
            pl.BlockSpec((TILE, D), lambda i: (i, 0)),   # x row tile (pipelined)
            pl.BlockSpec((D, H), lambda i: (0, 0)),      # W1 resident
            pl.BlockSpec((1, H), lambda i: (0, 0)),      # b1 resident
            pl.BlockSpec((1, H), lambda i: (0, 0)),      # w2 resident
        ],
        out_specs=pl.BlockSpec((1, TILE), lambda i: (0, i)),  # lane-dense slab
        compiler_params=pltpu.CompilerParams(
            dimension_semantics=("parallel",),
            vmem_limit_bytes=vmem_limit,
        ),
        cost_estimate=cost,
    )(x, w1, b1_row, w2_row)

    # Layout plumbing back to the PyTorch convention: (S, B).
    prediction = p_slab[0, :N].reshape(B, S).T

    if mask is not None:
        scores = beta * mask.T.astype(jnp.float32) + (1.0 - beta) * prediction
    else:
        # TODO(synk): PyTorch would raise here (mask.transpose on None); we
        # blend with an implicit zero mask instead of crashing.
        scores = (1.0 - beta) * prediction

    # predictions = (scores + 0.5).long(); truncation == rounding since
    # scores >= 0 for beta in [0, 1].
    predictions = (scores + 0.5).astype(jnp.int32)

    return scores, None, {"attention_score": None, "sequence": predictions}


if __name__ == "__main__":
    # Small shapes consistent with the module: batch=2, seq=8, feature=32, hidden=32
    B, S, D, H = 2, 8, 32, 32
    beta = 0.25  # non-trivial value to exercise the beta-blend

    key = jax.random.PRNGKey(0)
    k_x, k_w1, k_b1, k_w2, k_m = jax.random.split(key, 5)

    encoder_outputs = jax.random.normal(k_x, (B, S, D), dtype=jnp.float32)
    # nn.Linear-style uniform(-1/sqrt(fan_in), 1/sqrt(fan_in)) init
    bound1 = 1.0 / jnp.sqrt(jnp.float32(D))
    w1 = jax.random.uniform(k_w1, (D, H), minval=-bound1, maxval=bound1,
                            dtype=jnp.float32)
    b1 = jax.random.uniform(k_b1, (H,), minval=-bound1, maxval=bound1,
                            dtype=jnp.float32)
    bound2 = 1.0 / jnp.sqrt(jnp.float32(H))
    w2 = jax.random.uniform(k_w2, (H,), minval=-bound2, maxval=bound2,
                            dtype=jnp.float32)
    mask = (jax.random.uniform(k_m, (B, S)) > 0.5).astype(jnp.int32)

    scores, _, extras = copy_predictor_forward(encoder_outputs, mask, w1, b1, w2, beta)
    jax.block_until_ready(scores)
    jax.block_until_ready(extras["sequence"])

    # Reference check in plain JAX (same math as the PyTorch module).
    h_ref = jnp.maximum(encoder_outputs.reshape(B * S, D) @ w1 + b1, 0.0)
    p_ref = jax.nn.sigmoid(h_ref @ w2.reshape(H, 1)).reshape(B, S).T
    scores_ref = beta * mask.T.astype(jnp.float32) + (1.0 - beta) * p_ref
    preds_ref = (scores_ref + 0.5).astype(jnp.int32)

    assert scores.shape == (S, B) and extras["sequence"].shape == (S, B)
    assert jnp.allclose(scores, scores_ref, atol=1e-5, rtol=1e-5)
    assert jnp.array_equal(extras["sequence"], preds_ref)

    # Also exercise the beta == 1 early-return branch.
    s1, _, e1 = copy_predictor_forward(encoder_outputs, mask, w1, b1, w2, 1)
    assert jnp.array_equal(s1, mask.T.astype(jnp.float32)) and e1 is None

    print("KERNEL_OK")
</pallas_src>

<mosaic_0001>
module attributes {stable_mosaic.version = 11 : i64} {
  func.func @copy_predictor_kernel(%arg0: i32, %arg1: memref<128x32xf32, #tpu.memory_space<vmem>>, %arg2: memref<32x32xf32, #tpu.memory_space<vmem>>, %arg3: memref<1x32xf32, #tpu.memory_space<vmem>>, %arg4: memref<1x32xf32, #tpu.memory_space<vmem>>, %arg5: memref<1x128xf32, #tpu.memory_space<vmem>>) attributes {dimension_semantics = [#tpu.dimension_semantics<parallel>], iteration_bounds = array<i64: 1>, scalar_prefetch = 0 : i64, scratch_operands = 0 : i64, tpu.core_type = #tpu.core_type<tc>, window_params = [{transform_indices = @transform_0, window_bounds = array<i64: 128, 32>}, {pipeline_mode = #tpu.pipeline_mode<synchronous>, transform_indices = @transform_1, window_bounds = array<i64: 32, 32>}, {pipeline_mode = #tpu.pipeline_mode<synchronous>, transform_indices = @transform_2, window_bounds = array<i64: 1, 32>}, {pipeline_mode = #tpu.pipeline_mode<synchronous>, transform_indices = @transform_3, window_bounds = array<i64: 1, 32>}, {transform_indices = @transform_4, window_bounds = array<i64: 1, 128>}]} {
    %c0 = arith.constant 0 : index
    %c0_0 = arith.constant 0 : index
    %0 = vector.load %arg1[%c0, %c0_0] : memref<128x32xf32, #tpu.memory_space<vmem>>, vector<128x32xf32>
    %c0_1 = arith.constant 0 : index
    %c0_2 = arith.constant 0 : index
    %1 = vector.load %arg2[%c0_1, %c0_2] : memref<32x32xf32, #tpu.memory_space<vmem>>, vector<32x32xf32>
    %cst = arith.constant dense<0.000000e+00> : vector<128x32xf32>
    %2 = tpu.matmul %0, %1, %cst {dimension_numbers = #tpu.dot_dimension_numbers<[1], [0], [0], [1], [0, 0, 1, 1], [], []>} : vector<128x32xf32>, vector<32x32xf32>, vector<128x32xf32> -> vector<128x32xf32>
    %c0_3 = arith.constant 0 : index
    %c0_4 = arith.constant 0 : index
    %3 = vector.load %arg3[%c0_3, %c0_4] : memref<1x32xf32, #tpu.memory_space<vmem>>, vector<1x32xf32>
    %4 = vector.broadcast %3 : vector<1x32xf32> to vector<128x32xf32>
    %5 = arith.addf %2, %4 : vector<128x32xf32>
    %cst_5 = arith.constant 0.000000e+00 : f32
    %6 = vector.broadcast %cst_5 : f32 to vector<128x32xf32>
    %7 = arith.maximumf %5, %6 : vector<128x32xf32>
    %c0_6 = arith.constant 0 : index
    %c0_7 = arith.constant 0 : index
    %8 = vector.load %arg4[%c0_6, %c0_7] : memref<1x32xf32, #tpu.memory_space<vmem>>, vector<1x32xf32>
    %cst_8 = arith.constant dense<0.000000e+00> : vector<1x128xf32>
    %9 = tpu.matmul %8, %7, %cst_8 {dimension_numbers = #tpu.dot_dimension_numbers<[1], [1], [0], [0], [0, 0, 1, 0], [], []>} : vector<1x32xf32>, vector<128x32xf32>, vector<1x128xf32> -> vector<1x128xf32>
    %10 = arith.negf %9 : vector<1x128xf32>
    %11 = math.exp %10 : vector<1x128xf32>
    %cst_9 = arith.constant 1.000000e+00 : f32
    %12 = vector.broadcast %cst_9 : f32 to vector<1x128xf32>
    %13 = arith.addf %12, %11 : vector<1x128xf32>
    %14 = arith.divf %12, %13 : vector<1x128xf32>
    %c0_10 = arith.constant 0 : index
    %c0_11 = arith.constant 0 : index
    %15 = vector.load %arg5[%c0_10, %c0_11] : memref<1x128xf32, #tpu.memory_space<vmem>>, vector<1x128xf32>
    tpu.vector_store %arg5[%c0_10, %c0_11], %14 {strides = array<i32>} : memref<1x128xf32, #tpu.memory_space<vmem>>, vector<1x128xf32>,
    return
  }
  func.func @transform_0(%arg0: i32) -> (i32, i32) {
    %c0_i32 = arith.constant 0 : i32
    %c0_i32_0 = arith.constant 0 : i32
    return %arg0, %c0_i32 : i32, i32
  }
  func.func @transform_1(%arg0: i32) -> (i32, i32) {
    %c0_i32 = arith.constant 0 : i32
    %c0_i32_0 = arith.constant 0 : i32
    %c0_i32_1 = arith.constant 0 : i32
    return %c0_i32, %c0_i32_0 : i32, i32
  }
  func.func @transform_2(%arg0: i32) -> (i32, i32) {
    %c0_i32 = arith.constant 0 : i32
    %c0_i32_0 = arith.constant 0 : i32
    %c0_i32_1 = arith.constant 0 : i32
    return %c0_i32, %c0_i32_0 : i32, i32
  }
  func.func @transform_3(%arg0: i32) -> (i32, i32) {
    %c0_i32 = arith.constant 0 : i32
    %c0_i32_0 = arith.constant 0 : i32
    %c0_i32_1 = arith.constant 0 : i32
    return %c0_i32, %c0_i32_0 : i32, i32
  }
  func.func @transform_4(%arg0: i32) -> (i32, i32) {
    %c0_i32 = arith.constant 0 : i32
    %c0_i32_0 = arith.constant 0 : i32
    return %c0_i32, %arg0 : i32, i32
  }
}

</mosaic_0001>

<bundles_post_ra>
// kernel: tpu_custom_call.1
= control target key start
LH: loop header
LB: loop body
LE: loop exit
PB: predicated region body
PF: predicated region fallthrough
CT: control target
= control target key end

     0   :  { %vm45_vm0 = vcmask 261120   ;;  %s763_s0 = inlined_call_operand.vmem [shape: f32[128,32], index: 0, kind: input, shape index: {}]   ;;  %s764_s1 = inlined_call_operand.vmem [shape: f32[32,32], index: 1, kind: input, shape index: {}]   ;;  %s765_s2 = inlined_call_operand.vmem [shape: f32[1,32], index: 2, kind: input, shape index: {}]   ;;  %s766_s3 = inlined_call_operand.vmem [shape: f32[1,32], index: 3, kind: input, shape index: {}]   ;;  %s767_s4 = inlined_call_operand.hbm [shape: f32[1,128], index: 4, kind: output, shape index: {}]  }
   0x1   :  { %v34_v0 = vld [vmem:[%s764_s1] sm:$0xff]  ;;  %v35_v1 = vld [vmem:[%s764_s1 + $0x8] sm:$0xff]  ;;  %v36_v2 = vld [vmem:[%s764_s1 + $0x10] sm:$0xff] }
   0x2   :  { %v537_v3 = vpack.c.bf16 %v35_v1, %v34_v0  ;;  %v37_v4 = vld [vmem:[%s764_s1 + $0x18] sm:$0xff]  ;;  %v18_v5 = vld [vmem:[%s763_s0] sm:$0xff] }
   0x3   :  { %v541_v6 = vpack.c.bf16 %v37_v4, %v36_v2  ;;  %478 = vmatprep.mubr.msk.f32.mxu0 %vm45_vm0, %v18_v5 }
   0x4   :  { %538 = vmatprep.subr.bf16.mxu0 %v537_v3 }
   0x5   :  { %540 = vmatpush3.bf16.msra.mxu0 %v537_v3 }
   0x6   :  { %542 = vmatprep.subr.bf16.mxu0 %v541_v6 }
   0x7   :  { %9 = vsyncpa [#allocation3], 0  ;;  %v19_v7 = vld [vmem:[%s763_s0 + $0x8] sm:$0xff]  ;;  %v20_v8 = vld [vmem:[%s763_s0 + $0x10] sm:$0xff]  ;;  %v609_v22 = vmov 0.0|0.0   ;;  %vm610_vm1 = vmmov 0  }
   0x8   :  { %v21_v9 = vld [vmem:[%s763_s0 + $0x18] sm:$0xff]  ;;  %v22_v10 = vld [vmem:[%s763_s0 + $0x20] sm:$0xff]  ;;  %v23_v11 = vld [vmem:[%s763_s0 + $0x28] sm:$0xff]  ;;  %545 = vmatprep.subr.bf16.mxu1 %v609_v22  ;;  %v611_v23 = vmov 0.0   ;;  %s612_s29 = smov [#allocation2]  }
   0x9   :  { %544 = vmatpush3.bf16.msra.mxu0 %v541_v6  ;;  %v24_v12 = vld [vmem:[%s763_s0 + $0x30] sm:$0xff]  ;;  %v25_v13 = vld [vmem:[%s763_s0 + $0x38] sm:$0xff]  ;;  %v26_v14 = vld [vmem:[%s763_s0 + $0x40] sm:$0xff]  ;;  %534 = vmatprep.mubr.msk.f32.mxu1 %vm610_vm1, %v611_v23  ;;  %s390_s30 = sshll.u32 %s612_s29, 4  ;;  %s391_s30 = int_to_ptr.vmem [resolvable:$true] %s390_s30 }
   0xa   :  { %v27_v15 = vld [vmem:[%s763_s0 + $0x48] sm:$0xff]  ;;  %v28_v16 = vld [vmem:[%s763_s0 + $0x50] sm:$0xff]  ;;  %v29_v17 = vld [vmem:[%s763_s0 + $0x58] sm:$0xff]  ;;  %s585_s5 = scalar_lea.vmem %s391_s30, 16  ;;  %s589_s6 = scalar_lea.vmem %s391_s30, 32 }
   0xb   :  { %v30_v18 = vld [vmem:[%s763_s0 + $0x60] sm:$0xff]  ;;  %v31_v19 = vld [vmem:[%s763_s0 + $0x68] sm:$0xff]  ;;  %v32_v20 = vld [vmem:[%s763_s0 + $0x70] sm:$0xff]  ;;  %p586_p0 = scmp.ne.s32.totalorder %s391_s30, %s585_s5  ;;  %p590_p1 = scmp.lt.s32.totalorder %s391_s30, %s391_s30 }
   0xc   :  { %479 = vmatmul.mubr.msk.f32.vlgmr.msra.gmra.mrb[0].mxu0 %vm45_vm0, %v19_v7  ;;  %v33_v21 = vld [vmem:[%s763_s0 + $0x78] sm:$0xff]  ;;  %v398_v24 = vld [vmem:[%s765_s2] ss:$0 sm:$0xff]  ;;  %vm720_vm2 = vmpackc.low %vm45_vm0, %vm45_vm0  ;;  %p591_p2 = scmp.lt.s32.totalorder %s589_s6, %s585_s5 }
   0xd   :  { %481 = vmatprep.mubr.msk.f32.mxu0 %vm45_vm0, %v20_v8 }
   0xe   :  { %p592_p3 = por %p591_p2, %p590_p1 }
  0x10   :  { %482 = vmatmul.mubr.msk.f32.gmra.mrb[2].mxu0 %vm45_vm0, %v21_v9  ;;  %p593_p4 = pnand %p592_p3, %p586_p0 }
  0x11   :  { %484 = vmatprep.mubr.msk.f32.mxu0 %vm45_vm0, %v22_v10 }
  0x14   :  { %485 = vmatmul.mubr.msk.f32.gmra.mrb[4].mxu0 %vm45_vm0, %v23_v11 }
  0x15   :  { %487 = vmatprep.mubr.msk.f32.mxu0 %vm45_vm0, %v24_v12 }
  0x18   :  { %488 = vmatmul.mubr.msk.f32.gmra.mrb[6].mxu0 %vm45_vm0, %v25_v13 }
  0x19   :  { %490 = vmatprep.mubr.msk.f32.mxu0 %vm45_vm0, %v26_v14 }
  0x1c   :  { %491 = vmatmul.mubr.msk.f32.gmra.mrb[8].mxu0 %vm45_vm0, %v27_v15 }
  0x1d   :  { %493 = vmatprep.mubr.msk.f32.mxu0 %vm45_vm0, %v28_v16 }
  0x20   :  { %494 = vmatmul.mubr.msk.f32.gmra.mrb[10].mxu0 %vm45_vm0, %v29_v17 }
  0x21   :  { %496 = vmatprep.mubr.msk.f32.mxu0 %vm45_vm0, %v30_v18  ;;  %v255_v18 = vld [vmem:[%s766_s3] sm:$0x1] }
  0x24   :  { %497 = vmatmul.mubr.msk.f32.gmra.mrb[12].mxu0 %vm45_vm0, %v31_v19 }
  0x25   :  { %499 = vmatprep.mubr.msk.f32.mxu0 %vm45_vm0, %v32_v20 }
  0x28   :  { %500 = vmatmul.mubr.msk.f32.gmra.mrb[14].mxu0 %vm45_vm0, %v33_v21 }
  0xdf   :  { %v480_v25 = vpop.f32.mrb[0].mxu0 }
  0xe0   :  { %v166_v26 = vadd.f32 %v480_v25, %v398_v24  ;;  %v160_v27 = vpop.f32.mrb[1].mxu0 }
  0xe1   :  { %v161_v28 = vadd.f32 %v398_v24, %v160_v27 }
  0xe2   :  { %v240_v29 = vmax.f32 %v166_v26, 0.0 }
  0xe3   :  { %v239_v30 = vmax.f32 %v161_v28, 0.0  ;;  %v483_v31 = vpop.f32.mrb[2].mxu0 }
  0xe4   :  { %v176_v32 = vadd.f32 %v483_v31, %v398_v24  ;;  %v170_v33 = vpop.f32.mrb[3].mxu0 }
  0xe5   :  { %v546_v35 = vpack.c.bf16 %v240_v29, %v239_v30  ;;  %v171_v36 = vadd.f32 %v398_v24, %v170_v33 }
  0xe6   :  { %v242_v37 = vmax.f32 %v176_v32, 0.0 }
  0xe7   :  { %v241_v38 = vmax.f32 %v171_v36, 0.0  ;;  %548 = vmatpush3.bf16.xpose.msk.msra.mxu1 %vm720_vm2, %v546_v35  ;;  %v486_v39 = vpop.f32.mrb[4].mxu0 }
  0xe8   :  { %v186_v40 = vadd.f32 %v486_v39, %v398_v24  ;;  %549 = vmatprep.subr.bf16.mxu1 %v609_v22  ;;  %v180_v41 = vpop.f32.mrb[5].mxu0 }
  0xe9   :  { %v550_v42 = vpack.c.bf16 %v242_v37, %v241_v38  ;;  %v181_v43 = vadd.f32 %v398_v24, %v180_v41 }
  0xea   :  { %v244_v44 = vmax.f32 %v186_v40, 0.0 }
  0xeb   :  { %v243_v45 = vmax.f32 %v181_v43, 0.0  ;;  %v489_v46 = vpop.f32.mrb[6].mxu0 }
  0xec   :  { %v196_v47 = vadd.f32 %v489_v46, %v398_v24  ;;  %v190_v48 = vpop.f32.mrb[7].mxu0 }
  0xed   :  { %v554_v49 = vpack.c.bf16 %v244_v44, %v243_v45  ;;  %v191_v50 = vadd.f32 %v398_v24, %v190_v48 }
  0xee   :  { %v246_v51 = vmax.f32 %v196_v47, 0.0 }
  0xef   :  { %552 = vmatpush3.bf16.xpose.msk.msra.mxu1 %vm720_vm2, %v550_v42  ;;  %v245_v52 = vmax.f32 %v191_v50, 0.0  ;;  %v492_v53 = vpop.f32.mrb[8].mxu0 }
  0xf0   :  { %553 = vmatprep.subr.bf16.mxu1 %v609_v22  ;;  %v206_v54 = vadd.f32 %v492_v53, %v398_v24  ;;  %v200_v55 = vpop.f32.mrb[9].mxu0 }
  0xf1   :  { %v558_v56 = vpack.c.bf16 %v246_v51, %v245_v52  ;;  %v201_v57 = vadd.f32 %v398_v24, %v200_v55 }
  0xf2   :  { %v248_v58 = vmax.f32 %v206_v54, 0.0 }
  0xf3   :  { %v247_v59 = vmax.f32 %v201_v57, 0.0  ;;  %v495_v60 = vpop.f32.mrb[10].mxu0 }
  0xf4   :  { %v216_v61 = vadd.f32 %v495_v60, %v398_v24  ;;  %v210_v62 = vpop.f32.mrb[11].mxu0 }
  0xf5   :  { %v562_v63 = vpack.c.bf16 %v248_v58, %v247_v59  ;;  %v211_v0 = vadd.f32 %v398_v24, %v210_v62 }
  0xf6   :  { %v250_v1 = vmax.f32 %v216_v61, 0.0 }
  0xf7   :  { %556 = vmatpush3.bf16.xpose.msk.msra.mxu1 %vm720_vm2, %v554_v49  ;;  %v249_v2 = vmax.f32 %v211_v0, 0.0  ;;  %v498_v3 = vpop.f32.mrb[12].mxu0 }
  0xf8   :  { %557 = vmatprep.subr.bf16.mxu1 %v609_v22  ;;  %v226_v4 = vadd.f32 %v498_v3, %v398_v24  ;;  %v220_v5 = vpop.f32.mrb[13].mxu0 }
  0xf9   :  { %v566_v6 = vpack.c.bf16 %v250_v1, %v249_v2  ;;  %v221_v7 = vadd.f32 %v398_v24, %v220_v5 }
  0xfa   :  { %v252_v8 = vmax.f32 %v226_v4, 0.0 }
  0xfb   :  { %v251_v9 = vmax.f32 %v221_v7, 0.0  ;;  %v501_v10 = vpop.f32.mrb[14].mxu0 }
  0xfc   :  { %v236_v11 = vadd.f32 %v501_v10, %v398_v24  ;;  %v230_v12 = vpop.f32.mrb[15].mxu0 }
  0xfd   :  { %v570_v13 = vpack.c.bf16 %v252_v8, %v251_v9  ;;  %v231_v14 = vadd.f32 %v398_v24, %v230_v12 }
  0xfe   :  { %v254_v15 = vmax.f32 %v236_v11, 0.0 }
  0xff   :  { %560 = vmatpush3.bf16.xpose.msk.msra.mxu1 %vm720_vm2, %v558_v56  ;;  %v253_v16 = vmax.f32 %v231_v14, 0.0 }
 0x100   :  { %561 = vmatprep.subr.bf16.mxu1 %v609_v22 }
 0x101   :  { %v574_v17 = vpack.c.bf16 %v254_v15, %v253_v16 }
 0x107   :  { %564 = vmatpush3.bf16.xpose.msk.msra.mxu1 %vm720_vm2, %v562_v63 }
 0x108   :  { %565 = vmatprep.subr.bf16.mxu1 %v609_v22 }
 0x10f   :  { %568 = vmatpush3.bf16.xpose.msk.msra.mxu1 %vm720_vm2, %v566_v6 }
 0x110   :  { %569 = vmatprep.subr.bf16.mxu1 %v609_v22 }
 0x117   :  { %572 = vmatpush3.bf16.xpose.msk.msra.mxu1 %vm720_vm2, %v570_v13 }
 0x118   :  { %573 = vmatprep.subr.bf16.mxu1 %v609_v22 }
 0x11f   :  { %576 = vmatpush3.bf16.xpose.msk.msra.mxu1 %vm720_vm2, %v574_v17 }
 0x126   :  { %535 = vmatmul.mubr.msk.f32.vlgmr.msra.gmra.mrb[0].mxu1 %vm45_vm0, %v255_v18 }
 0x1f9   :  { %v373_v19 = vpop.f32.mrb[0].mxu1 }
 0x1fa   :  { %v432_v20 = vmul.f32 -1.442695, %v373_v19  ;;  %v536_v21 = vpop.f32.mrb[1].mxu1 }
 0x1fc   :  { %581 = vpow2.f32 %v432_v20 }
 0x206   :  { %v582_v23 = vpop.eup %581 }
 0x207   :  { %v380_v24 = vadd.f32 1.0, %v582_v23 }
 0x209   :  { %583 = vrcp.f32 %v380_v24 }
 0x213   :  { %v584_v22 = vpop.eup %583 }
 0x214   :  { %383 = vst [vmem:[#allocation2] sm:$0x1] %v584_v22 }
 0x215   :  { %596 = shalt.err (!%p593_p4)
}
 0x216   :  { %s597_s8 = scalar_lea.hbm %s767_s4, 16 }
 0x217   :  { %p598_p5 = scmp.ne.s32.totalorder %s767_s4, %s597_s8  ;;  %p601_p6 = scmp.lt.u32.totalorder %s597_s8, %s767_s4 }
 0x219   :  { %p603_p7 = pnand %p601_p6, %p598_p5 }
 0x21b   :  { %606 = shalt.err (!%p603_p7)
}
 0x21c   :  { %393 = dma.vmem_to_hbm [thread:$0]  %s391_s30, 16, %s767_s4, [#allocation3]  }
 0x21d   :  { %607 = dma.done.wait [#allocation3], 16  }
 0x21e   :  { %608 = vsyncadd [#allocation3], 4294967280 }
 0x21f   :  { %397 = vsyncpa [#allocation3], 1 }

</bundles_post_ra>
